<compile_context>
chip_gen: v7x
topology: tpu7x:2x2x1
jax: 0.10.0
libtpu: 0.0.40
codegen_flags: <defaults>
</compile_context>

<pallas_src>
import functools
import math

import jax
import jax.numpy as jnp
from jax import lax
from jax.experimental import pallas as pl
from jax.experimental.pallas import tpu as pltpu

_MIB = 1024 * 1024


# --------------------------------------------------------------------------- #
# Generation-aware configuration / tile picking.
# --------------------------------------------------------------------------- #
def _tpu_generation() -> str:
    try:
        kind = jax.devices()[0].device_kind.lower()
    except Exception:
        return "unknown"
    if "v7" in kind:
        return "v7x"
    if "v6" in kind:
        return "v6e"
    if "v5" in kind:
        return "v5e"
    return "unknown"


def _gen_config(gen: str):
    """(row_tile_pref, col_tile_pref, tile_align, vmem_limit_bytes)."""
    if gen == "v6e":
        # 918 TF/s vs ~1.35 TB/s -> needs large row tiles to be compute-bound.
        return 1024, 512, 256, 96 * _MIB
    if gen == "v7x":
        # Per-TC VMEM is only 64 MiB; ~3.2 TB/s HBM needs far less intensity.
        return 512, 512, 256, 48 * _MIB
    if gen == "v5e":
        # 4x128^2 MXU; 128-aligned tiles are enough. Scoped default is 16 MiB.
        return 512, 512, 128, 96 * _MIB
    return 512, 512, 128, 64 * _MIB


def _round_up(x: int, m: int) -> int:
    return ((x + m - 1) // m) * m


def _largest_aligned_divisor(total: int, cap: int, align: int) -> int:
    """Largest multiple of `align` dividing `total` and <= cap.  Falls back to
    `total` only when total < align (small-problem single full block)."""
    cap = min(cap, total)
    c = (cap // align) * align
    while c >= align:
        if total % c == 0:
            return c
        c -= align
    return total


def _main_fits(tm: int, tn: int, d: int, budget: int) -> bool:
    row = 2 * tm * d * 2          # bf16 row block, double buffered
    col = 2 * tn * d * 2          # bf16 col block, double buffered
    inter = 2 * tm * tn * 4       # sim + exp f32 intermediates
    small = 6 * tm * 4            # acc scratch + (tm,1) blocks
    return row + col + inter + small <= budget


def _prep_fits(tb: int, d: int, budget: int) -> bool:
    ins = 2 * 2 * tb * d * 4      # two f32 inputs, double buffered
    outs = 2 * (2 * tb * d * 2)   # (2, tb, D) bf16 output, double buffered
    inter = 4 * tb * d * 4        # f32 intermediates (generous)
    return ins + outs + inter <= budget


# --------------------------------------------------------------------------- #
# Prep kernel: normalize, fold 1/sqrt(tau), bf16 cast, positives, self-sim.
# --------------------------------------------------------------------------- #
def _prep_kernel(stu_ref, tea_ref, reps_ref, pos_ref, selfsim_ref, *, inv_sqrt_tau):
    eps = 1e-12  # F.normalize default eps
    stu = stu_ref[...].astype(jnp.float32)
    tea = tea_ref[...].astype(jnp.float32)

    stu_sq = jnp.sum(stu * stu, axis=1, keepdims=True)
    tea_sq = jnp.sum(tea * tea, axis=1, keepdims=True)
    # 1/max(||x||, eps) folded with 1/sqrt(tau): one EUP rsqrt + one multiply.
    stu_scale = lax.rsqrt(jnp.maximum(stu_sq, eps * eps)) * inv_sqrt_tau
    tea_scale = lax.rsqrt(jnp.maximum(tea_sq, eps * eps)) * inv_sqrt_tau

    i_s = stu * stu_scale          # normalize(student) / sqrt(tau)
    j_s = tea * tea_scale          # normalize(teacher) / sqrt(tau)

    # positives[k] = <i_k, j_k> / tau (both halves of the 2N rows share it).
    pos_ref[...] = jnp.sum(i_s * j_s, axis=1, keepdims=True)

    i_b = i_s.astype(reps_ref.dtype)
    j_b = j_s.astype(reps_ref.dtype)
    # representations = cat([i, j], 0): halves written straight into one output.
    reps_ref[0, :, :] = i_b
    reps_ref[1, :, :] = j_b

    # Diagonal of sim/tau, computed from the SAME rounded bf16 operand values the
    # MXU will see, so the main kernel can cancel the self-similarity exactly.
    i_f = i_b.astype(jnp.float32)
    j_f = j_b.astype(jnp.float32)
    selfsim_ref[0, :, :] = jnp.sum(i_f * i_f, axis=1, keepdims=True)
    selfsim_ref[1, :, :] = jnp.sum(j_f * j_f, axis=1, keepdims=True)


# --------------------------------------------------------------------------- #
# Main kernel: tiled (2N, 2N) similarity -> per-row log softmax denominator.
# --------------------------------------------------------------------------- #
def _logdenom_kernel(rows_ref, cols_ref, selfsim_ref, out_ref, acc_ref,
                     *, shift, pad_correction):
    col = pl.program_id(1)

    @pl.when(col == 0)
    def _init():
        acc_ref[...] = jnp.zeros_like(acc_ref)

    # (reps/sqrt(tau)) . (reps/sqrt(tau))^T == sim/tau; contraction on the last
    # dim of both operands (no transposed copy), bf16 MXU, f32 accumulation.
    sim = lax.dot_general(
        rows_ref[...], cols_ref[...],
        dimension_numbers=(((1,), (1,)), ((), ())),
        preferred_element_type=jnp.float32)

    # Constant shift only when 1/tau is large enough to threaten f32 overflow;
    # otherwise skip the per-tile (tm, tn) subtract entirely.
    e = jnp.exp(sim) if shift == 0.0 else jnp.exp(sim - shift)
    # TODO(synk): for small D on v6e/v7x the f32 exp can bind the single EUP; a
    # bf16-exp / f32-accumulate variant would free that slot (validate precision
    # at small tau before enabling).
    acc_ref[...] += jnp.sum(e, axis=1, keepdims=True)

    @pl.when(col == pl.num_programs(1) - 1)
    def _finalize():
        self_sim = selfsim_ref[...]
        self_e = jnp.exp(self_sim) if shift == 0.0 else jnp.exp(self_sim - shift)
        denom = acc_ref[...] - self_e
        if pad_correction != 0.0:      # zero-padded columns contribute exp(-shift)
            denom = denom - pad_correction
        lg = jnp.log(denom)
        out_ref[...] = lg + shift if shift != 0.0 else lg


# --------------------------------------------------------------------------- #
# Wrapper.
# --------------------------------------------------------------------------- #
def contrastive_loss(teacher_logits, noisy_stu_logits, *, tau=1.0, batch_size=None,
                     matmul_dtype=jnp.bfloat16, row_tile=None, col_tile=None,
                     vmem_limit_bytes=None):
    """JAX/Pallas equivalent of the PyTorch contrastive_loss.forward."""
    N, D = teacher_logits.shape
    assert noisy_stu_logits.shape == (N, D)
    if batch_size is None:
        batch_size = N
    assert batch_size == N, "diag offsets require batch_size == input batch"
    # TODO(synk): D not a multiple of 128 reduces lane utilization; padding D is a
    # pure perf tweak (correctness is unaffected since D is a full-extent block).

    tau = float(tau)
    inv_tau = 1.0 / tau
    inv_sqrt_tau = 1.0 / math.sqrt(tau)
    two_n = 2 * N

    gen = _tpu_generation()
    tm_pref, tn_pref, align, vmem_limit = _gen_config(gen)
    if row_tile is not None:
        tm_pref = row_tile
    if col_tile is not None:
        tn_pref = col_tile
    if vmem_limit_bytes is not None:
        vmem_limit = vmem_limit_bytes
    budget = int(vmem_limit * 0.8)

    # ---- prep: normalize + 1/sqrt(tau) + bf16 cast + positives + self-sim ---- #
    tb_pref = 256
    while tb_pref > 8 and not _prep_fits(tb_pref, D, budget):
        tb_pref //= 2
    tb = _largest_aligned_divisor(N, tb_pref, 8)
    # TODO(synk): N not a multiple of 8 falls back to a single full-N prep block;
    # pad N upstream if that ever exceeds the VMEM budget.

    reps3, pos, selfsim3 = pl.pallas_call(
        functools.partial(_prep_kernel, inv_sqrt_tau=inv_sqrt_tau),
        grid=(N // tb,),
        in_specs=[
            pl.BlockSpec((tb, D), lambda i: (i, 0)),
            pl.BlockSpec((tb, D), lambda i: (i, 0)),
        ],
        out_specs=[
            pl.BlockSpec((2, tb, D), lambda i: (0, i, 0)),
            pl.BlockSpec((tb, 1), lambda i: (i, 0)),
            pl.BlockSpec((2, tb, 1), lambda i: (0, i, 0)),
        ],
        out_shape=(
            jax.ShapeDtypeStruct((2, N, D), matmul_dtype),
            jax.ShapeDtypeStruct((N, 1), jnp.float32),
            jax.ShapeDtypeStruct((2, N, 1), jnp.float32),
        ),
        compiler_params=pltpu.CompilerParams(
            dimension_semantics=("parallel",),
            vmem_limit_bytes=vmem_limit),
    )(noisy_stu_logits, teacher_logits)

    # "cat([i, j], 0)" is just a metadata reshape of the (2, N, D) output.
    reps = reps3.reshape(two_n, D)
    selfsim = selfsim3.reshape(two_n, 1)

    # ---- main-kernel tiling: tm is the arithmetic-intensity knob ------------- #
    while not _main_fits(tm_pref, tn_pref, D, budget) and tm_pref > 128:
        tm_pref //= 2
    while not _main_fits(tm_pref, tn_pref, D, budget) and tn_pref > 128:
        tn_pref //= 2
    # TODO(synk): for very large D (>= ~32K) add a K (D-chunk) grid axis instead
    # of shrinking the row/col tiles further.

    padded = _round_up(two_n, align) if two_n >= align else _round_up(two_n, 8)
    tile_align = min(align, padded)
    tm = _largest_aligned_divisor(padded, tm_pref, tile_align)
    tn = _largest_aligned_divisor(padded, tn_pref, tile_align)
    if gen == "v7x" and (padded // tm) % 2 == 1:
        # Keep the parallel row-grid even so both TensorCores stay busy.
        half = tm // 2
        if half >= 8 and half % 8 == 0 and padded % half == 0:
            tm = half

    n_pad = padded - two_n
    if n_pad:
        reps = jnp.pad(reps, ((0, n_pad), (0, 0)))
        selfsim = jnp.pad(selfsim, ((0, n_pad), (0, 0)))

    # Only pay the per-tile exp shift when 1/tau could overflow f32 exp.
    shift = inv_tau if inv_tau >= 60.0 else 0.0
    pad_correction = float(n_pad) * math.exp(-shift) if n_pad else 0.0

    logdenom = pl.pallas_call(
        functools.partial(_logdenom_kernel, shift=shift,
                          pad_correction=pad_correction),
        grid=(padded // tm, padded // tn),
        in_specs=[
            pl.BlockSpec((tm, D), lambda i, j: (i, 0)),   # rows (constant over j)
            pl.BlockSpec((tn, D), lambda i, j: (j, 0)),   # columns
            pl.BlockSpec((tm, 1), lambda i, j: (i, 0)),   # per-row diag of sim/tau
        ],
        out_specs=pl.BlockSpec((tm, 1), lambda i, j: (i, 0)),
        out_shape=jax.ShapeDtypeStruct((padded, 1), jnp.float32),
        scratch_shapes=[pltpu.VMEM((tm, 1), jnp.float32)],
        compiler_params=pltpu.CompilerParams(
            dimension_semantics=("parallel", "arbitrary"),
            vmem_limit_bytes=vmem_limit),
    )(reps, reps, selfsim)
    # TODO(synk): exploiting symmetry of the similarity matrix (upper-triangular
    # tile schedule with a resident (2N,1) accumulator) would halve MXU FLOPs and
    # HBM traffic; left out to keep the grid simple and v7x-parallel-friendly.

    # loss_partial[k] = -pos[k]/tau + log(denominator[k]); both halves share pos,
    # and pos already carries the 1/tau factor from the prefolded scaling.
    loss = (jnp.sum(logdenom[:two_n]) - 2.0 * jnp.sum(pos)) / (2.0 * N)
    return loss


def _reference_loss(teacher, student, tau):
    """Pure-JAX mirror of the PyTorch forward (f32 everywhere)."""
    eps = 1e-12
    n = teacher.shape[0]
    i = student / jnp.maximum(
        jnp.sqrt(jnp.sum(student * student, axis=1, keepdims=True)), eps)
    j = teacher / jnp.maximum(
        jnp.sqrt(jnp.sum(teacher * teacher, axis=1, keepdims=True)), eps)
    reps = jnp.concatenate([i, j], axis=0)
    sim = reps @ reps.T
    pos = jnp.concatenate(
        [jnp.diagonal(sim, offset=n), jnp.diagonal(sim, offset=-n)])
    mask = 1.0 - jnp.eye(2 * n, dtype=jnp.float32)
    denom = jnp.sum(mask * jnp.exp(sim / tau), axis=1)
    return jnp.sum(-jnp.log(jnp.exp(pos / tau) / denom)) / (2.0 * n)


if __name__ == "__main__":
    # Small deterministic example: batch=8, hidden=32 (module's tau=1 default).
    N, D = 8, 32
    key = jax.random.PRNGKey(0)
    k_tea, k_stu = jax.random.split(key)
    teacher_logits = jax.random.normal(k_tea, (N, D), dtype=jnp.float32)
    noisy_stu_logits = jax.random.normal(k_stu, (N, D), dtype=jnp.float32)

    loss = contrastive_loss(teacher_logits, noisy_stu_logits, tau=1.0, batch_size=N)
    loss = jax.block_until_ready(loss)

    ref = jax.block_until_ready(_reference_loss(teacher_logits, noisy_stu_logits, 1.0))
    assert abs(float(loss) - float(ref)) < 3e-2 * max(1.0, abs(float(ref))), (
        float(loss), float(ref))
    print("KERNEL_OK")
</pallas_src>

<mosaic_0001>
module attributes {stable_mosaic.version = 11 : i64} {
  func.func @_prep_kernel(%arg0: i32, %arg1: memref<8x32xf32, #tpu.memory_space<vmem>>, %arg2: memref<8x32xf32, #tpu.memory_space<vmem>>, %arg3: memref<2x8x32xbf16, #tpu.memory_space<vmem>>, %arg4: memref<8x1xf32, #tpu.memory_space<vmem>>, %arg5: memref<2x8x1xf32, #tpu.memory_space<vmem>>) attributes {dimension_semantics = [#tpu.dimension_semantics<parallel>], iteration_bounds = array<i64: 1>, scalar_prefetch = 0 : i64, scratch_operands = 0 : i64, tpu.core_type = #tpu.core_type<tc>, window_params = [{transform_indices = @transform_0, window_bounds = array<i64: 8, 32>}, {transform_indices = @transform_1, window_bounds = array<i64: 8, 32>}, {transform_indices = @transform_2, window_bounds = array<i64: 2, 8, 32>}, {transform_indices = @transform_3, window_bounds = array<i64: 8, 1>}, {transform_indices = @transform_4, window_bounds = array<i64: 2, 8, 1>}]} {
    %c0 = arith.constant 0 : index
    %c0_0 = arith.constant 0 : index
    %0 = vector.load %arg1[%c0, %c0_0] : memref<8x32xf32, #tpu.memory_space<vmem>>, vector<8x32xf32>
    %c0_1 = arith.constant 0 : index
    %c0_2 = arith.constant 0 : index
    %1 = vector.load %arg2[%c0_1, %c0_2] : memref<8x32xf32, #tpu.memory_space<vmem>>, vector<8x32xf32>
    %2 = arith.mulf %0, %0 : vector<8x32xf32>
    %cst = arith.constant dense<0.000000e+00> : vector<8xf32>
    %3 = vector.multi_reduction <add>, %2, %cst [1] : vector<8x32xf32> to vector<8xf32>
    %4 = vector.shape_cast %3 : vector<8xf32> to vector<8x1xf32>
    %5 = arith.mulf %1, %1 : vector<8x32xf32>
    %cst_3 = arith.constant dense<0.000000e+00> : vector<8xf32>
    %6 = vector.multi_reduction <add>, %5, %cst_3 [1] : vector<8x32xf32> to vector<8xf32>
    %7 = vector.shape_cast %6 : vector<8xf32> to vector<8x1xf32>
    %cst_4 = arith.constant 1.000000e-24 : f32
    %8 = vector.broadcast %cst_4 : f32 to vector<8x1xf32>
    %9 = arith.maximumf %4, %8 : vector<8x1xf32>
    %10 = math.rsqrt %9 : vector<8x1xf32>
    %cst_5 = arith.constant 1.000000e+00 : f32
    %11 = vector.broadcast %cst_5 : f32 to vector<8x1xf32>
    %12 = arith.mulf %10, %11 : vector<8x1xf32>
    %cst_6 = arith.constant 1.000000e-24 : f32
    %13 = vector.broadcast %cst_6 : f32 to vector<8x1xf32>
    %14 = arith.maximumf %7, %13 : vector<8x1xf32>
    %15 = math.rsqrt %14 : vector<8x1xf32>
    %cst_7 = arith.constant 1.000000e+00 : f32
    %16 = vector.broadcast %cst_7 : f32 to vector<8x1xf32>
    %17 = arith.mulf %15, %16 : vector<8x1xf32>
    %18 = vector.broadcast %12 : vector<8x1xf32> to vector<8x32xf32>
    %19 = arith.mulf %0, %18 : vector<8x32xf32>
    %20 = vector.broadcast %17 : vector<8x1xf32> to vector<8x32xf32>
    %21 = arith.mulf %1, %20 : vector<8x32xf32>
    %22 = arith.mulf %19, %21 : vector<8x32xf32>
    %cst_8 = arith.constant dense<0.000000e+00> : vector<8xf32>
    %23 = vector.multi_reduction <add>, %22, %cst_8 [1] : vector<8x32xf32> to vector<8xf32>
    %24 = vector.shape_cast %23 : vector<8xf32> to vector<8x1xf32>
    %c0_9 = arith.constant 0 : index
    %c0_10 = arith.constant 0 : index
    %25 = vector.load %arg4[%c0_9, %c0_10] : memref<8x1xf32, #tpu.memory_space<vmem>>, vector<8x1xf32>
    tpu.vector_store %arg4[%c0_9, %c0_10], %24 {strides = array<i32>} : memref<8x1xf32, #tpu.memory_space<vmem>>, vector<8x1xf32>,
    %26 = arith.truncf %19 : vector<8x32xf32> to vector<8x32xbf16>
    %27 = arith.truncf %21 : vector<8x32xf32> to vector<8x32xbf16>
    %c0_11 = arith.constant 0 : index
    %c0_12 = arith.constant 0 : index
    %c0_13 = arith.constant 0 : index
    %28 = vector.load %arg3[%c0_11, %c0_12, %c0_13] : memref<2x8x32xbf16, #tpu.memory_space<vmem>>, vector<1x8x32xbf16>
    %29 = vector.shape_cast %28 : vector<1x8x32xbf16> to vector<8x32xbf16>
    %30 = vector.shape_cast %26 : vector<8x32xbf16> to vector<1x8x32xbf16>
    tpu.vector_store %arg3[%c0_11, %c0_12, %c0_13], %30 {strides = array<i32>} : memref<2x8x32xbf16, #tpu.memory_space<vmem>>, vector<1x8x32xbf16>,
    %c1 = arith.constant 1 : index
    %c0_14 = arith.constant 0 : index
    %c0_15 = arith.constant 0 : index
    %31 = vector.load %arg3[%c1, %c0_14, %c0_15] : memref<2x8x32xbf16, #tpu.memory_space<vmem>>, vector<1x8x32xbf16>
    %32 = vector.shape_cast %31 : vector<1x8x32xbf16> to vector<8x32xbf16>
    %33 = vector.shape_cast %27 : vector<8x32xbf16> to vector<1x8x32xbf16>
    tpu.vector_store %arg3[%c1, %c0_14, %c0_15], %33 {strides = array<i32>} : memref<2x8x32xbf16, #tpu.memory_space<vmem>>, vector<1x8x32xbf16>,
    %34 = arith.extf %26 : vector<8x32xbf16> to vector<8x32xf32>
    %35 = arith.extf %27 : vector<8x32xbf16> to vector<8x32xf32>
    %36 = arith.mulf %34, %34 : vector<8x32xf32>
    %cst_16 = arith.constant dense<0.000000e+00> : vector<8xf32>
    %37 = vector.multi_reduction <add>, %36, %cst_16 [1] : vector<8x32xf32> to vector<8xf32>
    %38 = vector.shape_cast %37 : vector<8xf32> to vector<8x1xf32>
    %c0_17 = arith.constant 0 : index
    %c0_18 = arith.constant 0 : index
    %c0_19 = arith.constant 0 : index
    %39 = vector.load %arg5[%c0_17, %c0_18, %c0_19] : memref<2x8x1xf32, #tpu.memory_space<vmem>>, vector<1x8x1xf32>
    %40 = vector.shape_cast %39 : vector<1x8x1xf32> to vector<8x1xf32>
    %41 = vector.shape_cast %38 : vector<8x1xf32> to vector<1x8x1xf32>
    tpu.vector_store %arg5[%c0_17, %c0_18, %c0_19], %41 {strides = array<i32>} : memref<2x8x1xf32, #tpu.memory_space<vmem>>, vector<1x8x1xf32>,
    %42 = arith.mulf %35, %35 : vector<8x32xf32>
    %cst_20 = arith.constant dense<0.000000e+00> : vector<8xf32>
    %43 = vector.multi_reduction <add>, %42, %cst_20 [1] : vector<8x32xf32> to vector<8xf32>
    %44 = vector.shape_cast %43 : vector<8xf32> to vector<8x1xf32>
    %c1_21 = arith.constant 1 : index
    %c0_22 = arith.constant 0 : index
    %c0_23 = arith.constant 0 : index
    %45 = vector.load %arg5[%c1_21, %c0_22, %c0_23] : memref<2x8x1xf32, #tpu.memory_space<vmem>>, vector<1x8x1xf32>
    %46 = vector.shape_cast %45 : vector<1x8x1xf32> to vector<8x1xf32>
    %47 = vector.shape_cast %44 : vector<8x1xf32> to vector<1x8x1xf32>
    tpu.vector_store %arg5[%c1_21, %c0_22, %c0_23], %47 {strides = array<i32>} : memref<2x8x1xf32, #tpu.memory_space<vmem>>, vector<1x8x1xf32>,
    return
  }
  func.func @transform_0(%arg0: i32) -> (i32, i32) {
    %c0_i32 = arith.constant 0 : i32
    %c0_i32_0 = arith.constant 0 : i32
    return %arg0, %c0_i32 : i32, i32
  }
  func.func @transform_1(%arg0: i32) -> (i32, i32) {
    %c0_i32 = arith.constant 0 : i32
    %c0_i32_0 = arith.constant 0 : i32
    return %arg0, %c0_i32 : i32, i32
  }
  func.func @transform_2(%arg0: i32) -> (i32, i32, i32) {
    %c0_i32 = arith.constant 0 : i32
    %c0_i32_0 = arith.constant 0 : i32
    %c0_i32_1 = arith.constant 0 : i32
    return %c0_i32, %arg0, %c0_i32_0 : i32, i32, i32
  }
  func.func @transform_3(%arg0: i32) -> (i32, i32) {
    %c0_i32 = arith.constant 0 : i32
    %c0_i32_0 = arith.constant 0 : i32
    return %arg0, %c0_i32 : i32, i32
  }
  func.func @transform_4(%arg0: i32) -> (i32, i32, i32) {
    %c0_i32 = arith.constant 0 : i32
    %c0_i32_0 = arith.constant 0 : i32
    %c0_i32_1 = arith.constant 0 : i32
    return %c0_i32, %arg0, %c0_i32_0 : i32, i32, i32
  }
}

</mosaic_0001>

<bundles_post_ra>
// kernel: tpu_custom_call.1
= control target key start
LH: loop header
LB: loop body
LE: loop exit
PB: predicated region body
PF: predicated region fallthrough
CT: control target
= control target key end

     0   :  { %10 = vsyncpa [#allocation3], 0  ;;  %s362_s0 = inlined_call_operand.hbm [shape: f32[8,32], index: 0, kind: input, shape index: {}]   ;;  %s363_s1 = inlined_call_operand.hbm [shape: f32[8,32], index: 1, kind: input, shape index: {}]   ;;  %s364_s2 = inlined_call_operand.hbm [shape: bf16[2,8,32], index: 2, kind: output, shape index: {0}]   ;;  %s365_s3 = inlined_call_operand.hbm [shape: f32[8,1], index: 3, kind: output, shape index: {1}]   ;;  %s366_s4 = inlined_call_operand.hbm [shape: f32[2,8,1], index: 4, kind: output, shape index: {2}]  }
   0x1   :  { %11 = vsyncpa [#allocation6], 0 }
   0x2   :  { %12 = vsyncpa [#allocation4], 0 }
   0x3   :  { %13 = vsyncpa [#allocation9], 0  ;;  %s260_s15 = smov [#allocation2]   ;;  %s261_s17 = smov [#allocation5]  }
   0x4   :  { %s20_s16 = sshll.u32 %s260_s15, 4  ;;  %s30_s18 = sshll.u32 %s261_s17, 4  ;;  %s21_s16 = int_to_ptr.vmem [resolvable:$true] %s20_s16  ;;  %s31_s18 = int_to_ptr.vmem [resolvable:$true] %s30_s18 }
   0x5   :  { %s142_s21 = scalar_lea.hbm %s362_s0, 128 }
   0x6   :  { %p143_p0 = scmp.ne.s32.totalorder %s362_s0, %s142_s21  ;;  %p146_p1 = scmp.lt.u32.totalorder %s142_s21, %s362_s0 }
   0x8   :  { %p148_p2 = pnand %p146_p1, %p143_p0 }
   0xa   :  { %151 = shalt.err (!%p148_p2)
}
   0xb   :  { %s152_s26 = scalar_lea.vmem %s21_s16, 128  ;;  %p157_p4 = scmp.lt.s32.totalorder %s21_s16, %s21_s16 }
   0xc   :  { %p153_p3 = scmp.ne.s32.totalorder %s21_s16, %s152_s26  ;;  %p158_p5 = scmp.lt.s32.totalorder %s152_s26, %s152_s26 }
   0xe   :  { %p159_p6 = por %p158_p5, %p157_p4 }
  0x10   :  { %p160_p7 = pnand %p159_p6, %p153_p3 }
  0x12   :  { %163 = shalt.err (!%p160_p7)
}
  0x13   :  { %23 = dma.hbm_to_vmem [thread:$0]  %s362_s0, 128, %s21_s16, [#allocation3]  }
  0x14   :  { %s164_s5 = scalar_lea.hbm %s363_s1, 128 }
  0x15   :  { %p165_p8 = scmp.ne.s32.totalorder %s363_s1, %s164_s5  ;;  %p168_p9 = scmp.lt.u32.totalorder %s164_s5, %s363_s1 }
  0x17   :  { %p170_p10 = pnand %p168_p9, %p165_p8 }
  0x19   :  { %173 = shalt.err (!%p170_p10)
}
  0x1a   :  { %s174_s10 = scalar_lea.vmem %s31_s18, 128  ;;  %p179_p12 = scmp.lt.s32.totalorder %s31_s18, %s31_s18 }
  0x1b   :  { %p175_p11 = scmp.ne.s32.totalorder %s31_s18, %s174_s10  ;;  %p180_p13 = scmp.lt.s32.totalorder %s174_s10, %s174_s10 }
  0x1d   :  { %p181_p0 = por %p180_p13, %p179_p12 }
  0x1f   :  { %p182_p1 = pnand %p181_p0, %p175_p11 }
  0x21   :  { %185 = shalt.err (!%p182_p1)
}
  0x22   :  { %33 = dma.hbm_to_vmem [thread:$0]  %s363_s1, 128, %s31_s18, [#allocation6]  }
  0x23   :  { %252 = dma.done.wait [#allocation3], 128  }
  0x24   :  { %253 = vsyncadd [#allocation3], 4294967168 }
  0x25   :  { %254 = dma.done.wait [#allocation6], 128  }
  0x26   :  { %255 = vsyncadd [#allocation6], 4294967168  ;;  %v40_v0 = vld [vmem:[#allocation2] sm:$0xff]  ;;  %vm43_vm0 = vcmask 261120   ;;  %v41_v1 = vld [vmem:[#allocation5] sm:$0xff]  ;;  %vm65_vm1 = vcmask 257024  }
  0x27   :  { %v42_v2 = vmul.f32 %v40_v0, %v40_v0  ;;  %v47_v3 = vmul.f32 %v41_v1, %v41_v1  ;;  %s262_s1 = smov [#allocation7]  }
  0x28   :  { %s87_s12 = sshll.u32 %s262_s1, 4  ;;  %s88_s12 = int_to_ptr.vmem [resolvable:$true] %s87_s12 }
  0x29   :  { %v44_v4 = vsel %vm43_vm0, %v42_v2, 0.0  ;;  %v48_v5 = vsel %vm43_vm0, %v47_v3, 0.0  ;;  %s186_s13 = scalar_lea.vmem %s88_s12, 128  ;;  %p191_p3 = scmp.lt.s32.totalorder %s88_s12, %s88_s12 }
  0x2a   :  { %45 = vadd.xlane.f32.xlu0 %v44_v4  ;;  %p187_p2 = scmp.ne.s32.totalorder %s88_s12, %s186_s13  ;;  %p192_p4 = scmp.lt.s32.totalorder %s186_s13, %s186_s13 }
  0x2c   :  { %p193_p5 = por %p192_p4, %p191_p3 }
  0x2e   :  { %49 = vadd.xlane.f32.xlu0 %v48_v5  ;;  %p194_p6 = pnand %p193_p5, %p187_p2 }
  0xb7   :  { %v46_v6 = vpop.xlane.xlu0 %45 }
  0xb8   :  { %v51_v7 = vmax.f32 %v46_v6, 1e-24 }
  0xba   :  { %138 = vrsqrt.f32 %v51_v7 }
  0xbb   :  { %v50_v8 = vpop.xlane.xlu0 %49 }
  0xbc   :  { %v53_v9 = vmax.f32 %v50_v8, 1e-24 }
  0xbe   :  { %140 = vrsqrt.f32 %v53_v9 }
  0xc4   :  { %v139_v10 = vpop.eup %138 }
  0xc5   :  { %v55_v11 = vmul.f32 %v139_v10, %v40_v0 }
  0xc7   :  { %v63_v12 = vpack.c.bf16 %v55_v11, %v55_v11 }
  0xc8   :  { %v141_v13 = vpop.eup %140 }
  0xc9   :  { %v56_v14 = vmul.f32 %v141_v13, %v41_v1  ;;  %v69_v15 = vunpack.c.l.bf16 %v63_v12  ;;  %66 = vst.msk [vmem:[#allocation7] sm:$0xf] %vm65_vm1, %v63_v12 }
  0xcb   :  { %v57_v16 = vmul.f32 %v56_v14, %v55_v11  ;;  %v64_v17 = vpack.c.bf16 %v56_v14, %v56_v14  ;;  %v71_v20 = vmul.f32 %v69_v15, %v69_v15 }
  0xcd   :  { %v58_v18 = vsel %vm43_vm0, %v57_v16, 0.0  ;;  %v70_v19 = vunpack.c.l.bf16 %v64_v17  ;;  %68 = vst.msk [vmem:[#allocation7 + $0x4] sm:$0xf] %vm65_vm1, %v64_v17  ;;  %v72_v23 = vsel %vm43_vm0, %v71_v20, 0.0 }
  0xce   :  { %59 = vadd.xlane.f32.xlu1 %v58_v18 }
  0xcf   :  { %v76_v21 = vmul.f32 %v70_v19, %v70_v19 }
  0xd1   :  { %v77_v22 = vsel %vm43_vm0, %v76_v21, 0.0 }
  0xd2   :  { %78 = vadd.xlane.f32.xlu0 %v77_v22  ;;  %73 = vadd.xlane.f32.xlu1 %v72_v23 }
  0xd3   :  { %197 = shalt.err (!%p194_p6)
}
  0xd4   :  { %s198_s16 = scalar_lea.hbm %s364_s2, 128 }
  0xd5   :  { %p199_p7 = scmp.ne.s32.totalorder %s364_s2, %s198_s16  ;;  %p202_p8 = scmp.lt.u32.totalorder %s198_s16, %s364_s2 }
  0xd7   :  { %p204_p9 = pnand %p202_p8, %p199_p7 }
  0xd9   :  { %207 = shalt.err (!%p204_p9)
}
  0xda   :  { %s263_s21 = smov 64   ;;  %s264_s22 = smov 4   ;;  %vm61_vm2 = vcmask 7168  }
  0xdb   :  { %93 = dma.vmem_to_hbm [thread:$0]  %s88_s12, 128, %s364_s2, [#allocation4], %s263_s21, %s263_s21, %s264_s22  }
  0xdc   :  { %s265_s25 = smov [#allocation8]   ;;  %s266_s27 = smov [#allocation10]  }
  0xdd   :  { %s100_s26 = sshll.u32 %s265_s25, 4  ;;  %s109_s28 = sshll.u32 %s266_s27, 4  ;;  %s101_s26 = int_to_ptr.vmem [resolvable:$true] %s100_s26  ;;  %s110_s28 = int_to_ptr.vmem [resolvable:$true] %s109_s28 }
  0xde   :  { %s208_s29 = scalar_lea.vmem %s101_s26, 128  ;;  %p213_p11 = scmp.lt.s32.totalorder %s101_s26, %s101_s26 }
  0xdf   :  { %p209_p10 = scmp.ne.s32.totalorder %s101_s26, %s208_s29  ;;  %p214_p12 = scmp.lt.s32.totalorder %s208_s29, %s208_s29 }
  0xe1   :  { %p215_p13 = por %p214_p12, %p213_p11 }
  0xe3   :  { %p216_p0 = pnand %p215_p13, %p209_p10 }
 0x15b   :  { %v60_v24 = vpop.xlane.xlu1 %59 }
 0x15c   :  { %62 = vst.msk [vmem:[#allocation8] sm:$0xff] %vm61_vm2, %v60_v24 }
 0x15d   :  { %219 = shalt.err (!%p216_p0)
}
 0x15e   :  { %s220_s2 = scalar_lea.hbm %s365_s3, 128 }
 0x15f   :  { %p221_p1 = scmp.ne.s32.totalorder %s365_s3, %s220_s2  ;;  %p224_p2 = scmp.lt.u32.totalorder %s220_s2, %s365_s3 }
 0x161   :  { %p226_p3 = pnand %p224_p2, %p221_p1 }
 0x163   :  { %229 = shalt.err (!%p226_p3)
}
 0x164   :  { %103 = dma.vmem_to_hbm [thread:$0]  %s101_s26, 128, %s365_s3, [#allocation9]   ;;  %v79_v25 = vpop.xlane.xlu0 %78  ;;  %v74_v26 = vpop.xlane.xlu1 %73 }
 0x165   :  { %81 = vst.msk [vmem:[#allocation10 + $0x8] sm:$0xff] %vm61_vm2, %v79_v25  ;;  %75 = vst.msk [vmem:[#allocation10] sm:$0xff] %vm61_vm2, %v74_v26  ;;  %s230_s11 = scalar_lea.vmem %s110_s28, 256  ;;  %p235_p5 = scmp.lt.s32.totalorder %s110_s28, %s110_s28 }
 0x166   :  { %p231_p4 = scmp.ne.s32.totalorder %s110_s28, %s230_s11  ;;  %p236_p6 = scmp.lt.s32.totalorder %s230_s11, %s230_s11 }
 0x168   :  { %p237_p7 = por %p236_p6, %p235_p5 }
 0x16a   :  { %p238_p8 = pnand %p237_p7, %p231_p4 }
 0x16c   :  { %241 = shalt.err (!%p238_p8)
}
 0x16d   :  { %s242_s13 = scalar_lea.hbm %s366_s4, 256 }
 0x16e   :  { %p243_p9 = scmp.ne.s32.totalorder %s366_s4, %s242_s13  ;;  %p246_p10 = scmp.lt.u32.totalorder %s242_s13, %s366_s4 }
 0x170   :  { %p248_p11 = pnand %p246_p10, %p243_p9 }
 0x172   :  { %251 = shalt.err (!%p248_p11)
}
 0x173   :  { %s267_s17 = smov 128   ;;  %s268_s18 = smov 8  }
 0x174   :  { %115 = dma.vmem_to_hbm [thread:$0]  %s110_s28, 256, %s366_s4, [#allocation9], %s267_s17, %s267_s17, %s268_s18  }
 0x175   :  { %256 = dma.done.wait [#allocation4], 128  }
 0x176   :  { %257 = vsyncadd [#allocation4], 4294967168 }
 0x177   :  { %258 = dma.done.wait [#allocation9], 384  }
 0x178   :  { %259 = vsyncadd [#allocation9], 4294966912 }
 0x179   :  { %125 = vsyncpa [#allocation3], 1 }
 0x17a   :  { %126 = vsyncpa [#allocation6], 1 }
 0x17b   :  { %127 = vsyncpa [#allocation4], 1 }
 0x17c   :  { %128 = vsyncpa [#allocation9], 1 }

</bundles_post_ra>
